<compile_context>
chip_gen: v7x
topology: tpu7x:2x2x1
jax: 0.10.0
libtpu: 0.0.40
codegen_flags: <defaults>
</compile_context>

<pallas_src>
import functools

import jax
import jax.numpy as jnp
from jax import lax
from jax.experimental import pallas as pl
from jax.experimental.pallas import tpu as pltpu


def _max_identity(dtype):
    dtype = jnp.dtype(dtype)
    if dtype == jnp.bool_:
        return jnp.array(False, dtype)
    if jnp.issubdtype(dtype, jnp.floating):
        # 1-byte float formats (fp8 e4m3 etc.) may not represent -inf; use the
        # most negative finite value there (equivalent as a max identity).
        if dtype.itemsize == 1:
            return jnp.array(jnp.finfo(dtype).min, dtype)
        return jnp.array(-jnp.inf, dtype)
    return jnp.array(jnp.iinfo(dtype).min, dtype)


def _round_up(a, m):
    return ((a + m - 1) // m) * m


def _erode_kernel(x_ref, o_ref, *, H, W, chunk, n_chunks):
    # x_ref / o_ref: (block_b, H*W); each row is one (n, c, d) image, row-major.
    HW = H * W
    neg = _max_identity(x_ref.dtype)

    # --- border masks: built ONCE on a (1, HW) row, broadcast over data rows ---
    pidx = lax.broadcasted_iota(jnp.int32, (1, HW), 1)
    wcol = pidx % W
    right_edge = wcol == (W - 1)    # lane is last column  -> no right neighbor
    left_edge = wcol == 0           # lane is first column -> no left neighbor
    bottom_edge = pidx >= (H - 1) * W   # last row  -> no row below
    top_edge = pidx < W                 # first row -> no row above

    def process(x):
        # Separable 3x3 max.  Step 1: max over W (shift by +-1 lane).
        # pltpu.roll: y[p] = x[(p - shift) mod HW]; wrap positions coincide with
        # the masked border lanes, so roll + mask is exact.
        right = pltpu.roll(x, (HW - 1) % HW, axis=1)   # == shift by -1
        left = pltpu.roll(x, 1 % HW, axis=1)
        right = jnp.where(right_edge, neg, right)
        left = jnp.where(left_edge, neg, left)
        m_w = jnp.maximum(jnp.maximum(x, right), left)
        # Step 2: max over H (shift by +-W lanes).
        down = pltpu.roll(m_w, (HW - W) % HW, axis=1)  # row below
        up = pltpu.roll(m_w, W % HW, axis=1)           # row above
        down = jnp.where(bottom_edge, neg, down)
        up = jnp.where(top_edge, neg, up)
        return jnp.maximum(jnp.maximum(m_w, down), up)

    if n_chunks == 1:
        o_ref[...] = process(x_ref[...])
    else:
        # Bound live temporaries: big DMA tile, small compute granule.
        def body(j, carry):
            start = pl.multiple_of(j * chunk, chunk)
            o_ref[pl.ds(start, chunk), :] = process(x_ref[pl.ds(start, chunk), :])
            return carry

        lax.fori_loop(0, n_chunks, body, 0)


def erode(x, *, target_block_bytes=2 * 1024 * 1024, chunk_bytes=256 * 1024):
    """MaxPool3d(kernel=(1,3,3), stride=(1,1,1), padding=(0,1,1)) over NCDHW input."""
    N, C, D, H, W = x.shape
    B = N * C * D
    HW = H * W
    x2 = x.reshape(B, HW)            # pure dim-collapse

    dtype = jnp.dtype(x.dtype)
    itemsize = dtype.itemsize
    row_bytes = HW * itemsize
    # Sublane packing: 8 rows for 4-byte, 16 for 2-byte, 32 for 1-byte dtypes.
    pack = 8 * max(1, 4 // max(1, itemsize))

    # Rows per inner-loop chunk (caps live temporaries to a few hundred KiB).
    chunk_cap = max(pack, (chunk_bytes // row_bytes) // pack * pack)

    if B <= chunk_cap:
        # Whole problem fits in one compute granule: single block, single chunk.
        # block_b == full dim -> always a legal BlockSpec regardless of alignment.
        block_b = B
        chunk = B
        grid_b = 1
    else:
        chunk = chunk_cap
        cap_rows = max(chunk, (target_block_bytes // row_bytes) // chunk * chunk)
        block_b = min(cap_rows, (B // chunk) * chunk)      # multiple of chunk
        grid_b = pl.cdiv(B, block_b)
        if grid_b > 1:
            # Balance blocks and make the grid even: on v7x the "parallel" axis
            # is sharded across 2 TensorCores; near-equal even splits avoid one
            # core idling.  On single-TC v5e/v6e this costs at most one extra
            # ~0.35us grid step.
            grid_b = grid_b + (grid_b % 2)
            block_b = _round_up(pl.cdiv(B, grid_b), chunk)  # stays multiple of chunk
            grid_b = pl.cdiv(B, block_b)
    n_chunks = block_b // chunk

    # NOTE: the last grid block may be partial.  That is safe ONLY because rows
    # (images) are fully independent: out-of-range rows read padding and their
    # writes are dropped.  Do not change the layout to mix rows across blocks.

    # VMEM accounting: in + out, double-buffered, plus ~8 chunk-sized temporaries
    # (counted at 4-byte width to be conservative) and compiler headroom.
    block_bytes = block_b * HW * itemsize
    scratch_bytes = 8 * chunk * HW * 4
    vmem_limit_bytes = 2 * 2 * block_bytes + scratch_bytes + (4 << 20)
    vmem_limit_bytes = min(max(vmem_limit_bytes, 16 << 20), 64 << 20)

    cost = pl.CostEstimate(
        flops=9 * B * HW,                       # ~8 max/select ops per element
        transcendentals=0,
        bytes_accessed=2 * B * HW * itemsize,   # read once, write once
    )

    kernel = functools.partial(_erode_kernel, H=H, W=W, chunk=chunk, n_chunks=n_chunks)
    out = pl.pallas_call(
        kernel,
        out_shape=jax.ShapeDtypeStruct((B, HW), x.dtype),
        grid_spec=pltpu.PrefetchScalarGridSpec(
            num_scalar_prefetch=0,
            grid=(grid_b,),
            in_specs=[pl.BlockSpec((block_b, HW), lambda i: (i, 0))],
            out_specs=pl.BlockSpec((block_b, HW), lambda i: (i, 0)),
        ),
        compiler_params=pltpu.CompilerParams(
            dimension_semantics=("parallel",),
            vmem_limit_bytes=vmem_limit_bytes,
        ),
        cost_estimate=cost,
    )(x2)

    return out.reshape(N, C, D, H, W)


def erode_ref(x):
    """Pure-JAX reference for correctness check."""
    N, C, D, H, W = x.shape
    xf = x.reshape(N * C * D, H, W)
    neg = jnp.array(-jnp.inf, x.dtype)
    xp = jnp.pad(xf, ((0, 0), (1, 1), (1, 1)), constant_values=neg)
    out = xp[:, 0:H, 0:W]
    for dh in range(3):
        for dw in range(3):
            out = jnp.maximum(out, xp[:, dh:dh + H, dw:dw + W])
    return out.reshape(N, C, D, H, W)


if __name__ == "__main__":
    key = jax.random.PRNGKey(0)
    # Small NCDHW input: batch=2, channels=4, depth=8, spatial=16x16
    x = jax.random.normal(key, (2, 4, 8, 16, 16), dtype=jnp.float32)

    y = jax.block_until_ready(erode(x))
    y_ref = erode_ref(x)

    assert y.shape == x.shape
    assert jnp.allclose(y, y_ref), "mismatch vs reference"

    print("KERNEL_OK")
</pallas_src>

<mosaic_0001>
module attributes {stable_mosaic.version = 11 : i64} {
  func.func @_erode_kernel(%arg0: i32, %arg1: memref<64x256xf32, #tpu.memory_space<vmem>>, %arg2: memref<64x256xf32, #tpu.memory_space<vmem>>) attributes {dimension_semantics = [#tpu.dimension_semantics<parallel>], iteration_bounds = array<i64: 1>, scalar_prefetch = 0 : i64, scratch_operands = 0 : i64, tpu.core_type = #tpu.core_type<tc>, window_params = [{transform_indices = @transform_0, window_bounds = array<i64: 64, 256>}, {transform_indices = @transform_1, window_bounds = array<i64: 64, 256>}]} {
    %0 = tpu.iota {dimensions = array<i32: 1>} : vector<1x256xi32>
    %c16_i32 = arith.constant 16 : i32
    %c0_i32 = arith.constant 0 : i32
    %1 = arith.cmpi eq, %c16_i32, %c0_i32 : i32
    %c1_i32 = arith.constant 1 : i32
    %2 = arith.select %1, %c1_i32, %c16_i32 : i32
    %3 = vector.broadcast %2 : i32 to vector<1x256xi32>
    %4 = arith.remsi %0, %3 : vector<1x256xi32>
    %c0_i32_0 = arith.constant 0 : i32
    %5 = vector.broadcast %c0_i32_0 : i32 to vector<1x256xi32>
    %6 = arith.cmpi ne, %4, %5 : vector<1x256xi32>
    %c0_i32_1 = arith.constant 0 : i32
    %7 = vector.broadcast %c0_i32_1 : i32 to vector<1x256xi32>
    %8 = arith.cmpi slt, %4, %7 : vector<1x256xi32>
    %c0_i32_2 = arith.constant 0 : i32
    %9 = arith.cmpi slt, %2, %c0_i32_2 : i32
    %10 = vector.broadcast %9 : i1 to vector<1x256xi1>
    %11 = vector.broadcast %10 : vector<1x256xi1> to vector<1x256xi1>
    %12 = arith.xori %8, %11 : vector<1x256xi1>
    %13 = arith.andi %12, %6 : vector<1x256xi1>
    %14 = vector.broadcast %2 : i32 to vector<1x256xi32>
    %15 = arith.addi %4, %14 : vector<1x256xi32>
    %16 = arith.select %13, %15, %4 : vector<1x256xi1>, vector<1x256xi32>
    %c15_i32 = arith.constant 15 : i32
    %17 = vector.broadcast %c15_i32 : i32 to vector<1x256xi32>
    %18 = arith.cmpi eq, %16, %17 : vector<1x256xi32>
    %c0_i32_3 = arith.constant 0 : i32
    %19 = vector.broadcast %c0_i32_3 : i32 to vector<1x256xi32>
    %20 = arith.cmpi eq, %16, %19 : vector<1x256xi32>
    %c240_i32 = arith.constant 240 : i32
    %21 = vector.broadcast %c240_i32 : i32 to vector<1x256xi32>
    %22 = arith.cmpi sge, %0, %21 : vector<1x256xi32>
    %c16_i32_4 = arith.constant 16 : i32
    %23 = vector.broadcast %c16_i32_4 : i32 to vector<1x256xi32>
    %24 = arith.cmpi slt, %0, %23 : vector<1x256xi32>
    %c0 = arith.constant 0 : index
    %c0_5 = arith.constant 0 : index
    %25 = vector.load %arg1[%c0, %c0_5] : memref<64x256xf32, #tpu.memory_space<vmem>>, vector<64x256xf32>
    %c255_i32 = arith.constant 255 : i32
    %26 = tpu.dynamic_rotate %25 by %c255_i32 dim 1 : vector<64x256xf32>, i32 -> vector<64x256xf32>
    %c1_i32_6 = arith.constant 1 : i32
    %27 = tpu.dynamic_rotate %25 by %c1_i32_6 dim 1 : vector<64x256xf32>, i32 -> vector<64x256xf32>
    %cst = arith.constant 0xFF800000 : f32
    %28 = vector.shape_cast %18 : vector<1x256xi1> to vector<1x256xi1>
    %29 = vector.broadcast %28 : vector<1x256xi1> to vector<64x256xi1>
    %30 = vector.broadcast %cst : f32 to vector<64x256xf32>
    %31 = arith.select %29, %30, %26 : vector<64x256xi1>, vector<64x256xf32>
    %cst_7 = arith.constant 0xFF800000 : f32
    %32 = vector.shape_cast %20 : vector<1x256xi1> to vector<1x256xi1>
    %33 = vector.broadcast %32 : vector<1x256xi1> to vector<64x256xi1>
    %34 = vector.broadcast %cst_7 : f32 to vector<64x256xf32>
    %35 = arith.select %33, %34, %27 : vector<64x256xi1>, vector<64x256xf32>
    %36 = arith.maximumf %25, %31 : vector<64x256xf32>
    %37 = arith.maximumf %36, %35 : vector<64x256xf32>
    %c240_i32_8 = arith.constant 240 : i32
    %38 = tpu.dynamic_rotate %37 by %c240_i32_8 dim 1 : vector<64x256xf32>, i32 -> vector<64x256xf32>
    %c16_i32_9 = arith.constant 16 : i32
    %39 = tpu.dynamic_rotate %37 by %c16_i32_9 dim 1 : vector<64x256xf32>, i32 -> vector<64x256xf32>
    %cst_10 = arith.constant 0xFF800000 : f32
    %40 = vector.shape_cast %22 : vector<1x256xi1> to vector<1x256xi1>
    %41 = vector.broadcast %40 : vector<1x256xi1> to vector<64x256xi1>
    %42 = vector.broadcast %cst_10 : f32 to vector<64x256xf32>
    %43 = arith.select %41, %42, %38 : vector<64x256xi1>, vector<64x256xf32>
    %cst_11 = arith.constant 0xFF800000 : f32
    %44 = vector.shape_cast %24 : vector<1x256xi1> to vector<1x256xi1>
    %45 = vector.broadcast %44 : vector<1x256xi1> to vector<64x256xi1>
    %46 = vector.broadcast %cst_11 : f32 to vector<64x256xf32>
    %47 = arith.select %45, %46, %39 : vector<64x256xi1>, vector<64x256xf32>
    %48 = arith.maximumf %37, %43 : vector<64x256xf32>
    %49 = arith.maximumf %48, %47 : vector<64x256xf32>
    %c0_12 = arith.constant 0 : index
    %c0_13 = arith.constant 0 : index
    %50 = vector.load %arg2[%c0_12, %c0_13] : memref<64x256xf32, #tpu.memory_space<vmem>>, vector<64x256xf32>
    tpu.vector_store %arg2[%c0_12, %c0_13], %49 {strides = array<i32>} : memref<64x256xf32, #tpu.memory_space<vmem>>, vector<64x256xf32>,
    return
  }
  func.func @transform_0(%arg0: i32) -> (i32, i32) {
    %c0_i32 = arith.constant 0 : i32
    %c0_i32_0 = arith.constant 0 : i32
    return %arg0, %c0_i32 : i32, i32
  }
  func.func @transform_1(%arg0: i32) -> (i32, i32) {
    %c0_i32 = arith.constant 0 : i32
    %c0_i32_0 = arith.constant 0 : i32
    return %arg0, %c0_i32 : i32, i32
  }
}

</mosaic_0001>

<bundles_post_ra>
// kernel: tpu_custom_call.1
= control target key start
LH: loop header
LB: loop body
LE: loop exit
PB: predicated region body
PF: predicated region fallthrough
CT: control target
= control target key end

     0   :  { %6 = vsyncpa [#allocation3], 0  ;;  %s1120_s0 = inlined_call_operand.hbm [shape: f32[64,256], index: 0, kind: input, shape index: {}]   ;;  %s1121_s1 = inlined_call_operand.hbm [shape: f32[64,256], index: 1, kind: output, shape index: {}]  }
   0x1   :  { %7 = vsyncpa [#allocation4], 0  ;;  %s501_s6 = smov [#allocation2]   ;;  %s453_s10 = scalar_lea.hbm %s1120_s0, 2048 }
   0x2   :  { %s13_s7 = sshll.u32 %s501_s6, 4  ;;  %p454_p0 = scmp.ne.s32.totalorder %s1120_s0, %s453_s10  ;;  %s14_s7 = int_to_ptr.vmem [resolvable:$true] %s13_s7 }
   0x3   :  { %p457_p1 = scmp.lt.u32.totalorder %s453_s10, %s1120_s0 }
   0x5   :  { %p459_p2 = pnand %p457_p1, %p454_p0 }
   0x7   :  { %462 = shalt.err (!%p459_p2)
}
   0x8   :  { %s463_s15 = scalar_lea.vmem %s14_s7, 2048  ;;  %p468_p4 = scmp.lt.s32.totalorder %s14_s7, %s14_s7 }
   0x9   :  { %p464_p3 = scmp.ne.s32.totalorder %s14_s7, %s463_s15  ;;  %p469_p5 = scmp.lt.s32.totalorder %s463_s15, %s463_s15 }
   0xb   :  { %p470_p6 = por %p469_p5, %p468_p4 }
   0xd   :  { %p471_p7 = pnand %p470_p6, %p464_p3 }
   0xf   :  { %474 = shalt.err (!%p471_p7)
}
  0x10   :  { %s502_s16 = smov 256   ;;  %s503_s17 = smov 16  }
  0x11   :  { %19 = dma.hbm_to_vmem [thread:$0]  %s1120_s0, 2048, %s14_s7, [#allocation3], %s502_s16, %s502_s16, %s503_s17  }
  0x12   :  { %497 = dma.done.wait [#allocation3], 2048  }
  0x13   :  { %498 = vsyncadd [#allocation3], 4294965248  ;;  %v533_v0 = vld [vmem:[#allocation2 + $0x20] sm:$0xff]  ;;  %s504_s20 = smov 127   ;;  %v539_v2 = vld [vmem:[#allocation2 + $0x30] sm:$0xff]  ;;  %s505_s0 = smov 1   ;;  %v23_v32 = vlaneseq }
  0x14   :  { %v535_v1 = vld [vmem:[#allocation2] sm:$0xff]  ;;  %78 = vrot.lane.b32.xlu1 %v533_v0, %s504_s20  ;;  %v541_v3 = vld [vmem:[#allocation2 + $0x10] sm:$0xff]  ;;  %v557_v8 = vld [vmem:[#allocation2 + $0x18] sm:$0xff]  ;;  %s506_s21 = smov 112   ;;  %s507_s22 = smov [#allocation5]  }
  0x15   :  { %74 = vrot.lane.b32.xlu0 %v535_v1, %s504_s20  ;;  %v545_v4 = vld [vmem:[#allocation2 + $0x50] sm:$0xff]  ;;  %v547_v5 = vld [vmem:[#allocation2 + $0x40] sm:$0xff]  ;;  %v559_v9 = vld [vmem:[#allocation2 + $0x8] sm:$0xff]  ;;  %v633_v35 = vand.u32 127, %v23_v32  ;;  %s434_s23 = sshll.u32 %s507_s22, 4  ;;  %s435_s23 = int_to_ptr.vmem [resolvable:$true] %s434_s23 }
  0x16   :  { %v551_v6 = vld [vmem:[#allocation2 + $0x70] sm:$0xff]  ;;  %v553_v7 = vld [vmem:[#allocation2 + $0x60] sm:$0xff]  ;;  %v563_v10 = vld [vmem:[#allocation2 + $0x38] sm:$0xff]  ;;  %s475_s24 = scalar_lea.vmem %s435_s23, 2048  ;;  %p480_p9 = scmp.lt.s32.totalorder %s435_s23, %s435_s23 }
  0x17   :  { %v565_v11 = vld [vmem:[#allocation2 + $0x28] sm:$0xff]  ;;  %v569_v12 = vld [vmem:[#allocation2 + $0x58] sm:$0xff]  ;;  %v30_v38 = vand.u32 15, %v633_v35  ;;  %vm106_vm0 = vcmp.lt.s32.totalorder %v633_v35, 127  ;;  %vm155_vm2 = vcmp.lt.s32.totalorder %v633_v35, 1  ;;  %v699_v62 = vadd.s32 128, %v633_v35  ;;  %p476_p8 = scmp.ne.s32.totalorder %s435_s23, %s475_s24  ;;  %p481_p10 = scmp.lt.s32.totalorder %s475_s24, %s475_s24 }
  0x18   :  { %80 = vrot.lane.b32.xlu1 %v539_v2, %s504_s20  ;;  %v571_v13 = vld [vmem:[#allocation2 + $0x48] sm:$0xff]  ;;  %v575_v14 = vld [vmem:[#allocation2 + $0x78] sm:$0xff]  ;;  %vm276_vm6 = vcmp.lt.s32.totalorder %v633_v35, 112  ;;  %vm56_vm8 = vcmp.lt.s32.totalorder %v633_v35, 16 }
  0x19   :  { %76 = vrot.lane.b32.xlu0 %v541_v3, %s504_s20  ;;  %v577_v15 = vld [vmem:[#allocation2 + $0x68] sm:$0xff]  ;;  %vm645_vm1 = vcmp.eq.s32.totalorder %v30_v38, 15  ;;  %vm674_vm3 = vcmp.eq.s32.totalorder %v30_v38, 0  ;;  %vm55_vm7 = vcmp.ge.s32.totalorder %v699_v62, 240  ;;  %p482_p11 = por %p481_p10, %p480_p9 }
  0x1b   :  { %p483_p12 = pnand %p482_p11, %p476_p8 }
  0x1c   :  { %84 = vrot.lane.b32.xlu1 %v545_v4, %s504_s20 }
  0x1d   :  { %82 = vrot.lane.b32.xlu0 %v547_v5, %s504_s20 }
  0x20   :  { %88 = vrot.lane.b32.xlu1 %v551_v6, %s504_s20 }
  0x21   :  { %86 = vrot.lane.b32.xlu0 %v553_v7, %s504_s20 }
  0x24   :  { %92 = vrot.lane.b32.xlu1 %v557_v8, %s504_s20 }
  0x25   :  { %90 = vrot.lane.b32.xlu0 %v559_v9, %s504_s20 }
  0x28   :  { %96 = vrot.lane.b32.xlu1 %v563_v10, %s504_s20 }
  0x29   :  { %94 = vrot.lane.b32.xlu0 %v565_v11, %s504_s20 }
  0x2c   :  { %100 = vrot.lane.b32.xlu1 %v569_v12, %s504_s20 }
  0x2d   :  { %98 = vrot.lane.b32.xlu0 %v571_v13, %s504_s20 }
  0x30   :  { %104 = vrot.lane.b32.xlu1 %v575_v14, %s504_s20 }
  0x31   :  { %102 = vrot.lane.b32.xlu0 %v577_v15, %s504_s20 }
  0x34   :  { %125 = vrot.lane.b32.xlu1 %v541_v3, %s505_s0 }
  0x35   :  { %123 = vrot.lane.b32.xlu0 %v535_v1, %s505_s0 }
  0x38   :  { %129 = vrot.lane.b32.xlu1 %v539_v2, %s505_s0 }
  0x39   :  { %127 = vrot.lane.b32.xlu0 %v533_v0, %s505_s0 }
  0x3c   :  { %133 = vrot.lane.b32.xlu1 %v545_v4, %s505_s0 }
  0x3d   :  { %131 = vrot.lane.b32.xlu0 %v547_v5, %s505_s0 }
  0x40   :  { %137 = vrot.lane.b32.xlu1 %v551_v6, %s505_s0 }
  0x41   :  { %135 = vrot.lane.b32.xlu0 %v553_v7, %s505_s0 }
  0x44   :  { %141 = vrot.lane.b32.xlu1 %v557_v8, %s505_s0 }
  0x45   :  { %139 = vrot.lane.b32.xlu0 %v559_v9, %s505_s0 }
  0x48   :  { %145 = vrot.lane.b32.xlu1 %v563_v10, %s505_s0 }
  0x49   :  { %143 = vrot.lane.b32.xlu0 %v565_v11, %s505_s0 }
  0x4c   :  { %149 = vrot.lane.b32.xlu1 %v569_v12, %s505_s0 }
  0x4d   :  { %147 = vrot.lane.b32.xlu0 %v571_v13, %s505_s0 }
  0x50   :  { %153 = vrot.lane.b32.xlu1 %v575_v14, %s505_s0 }
  0x51   :  { %151 = vrot.lane.b32.xlu0 %v577_v15, %s505_s0 }
  0x86   :  { %v597_v16 = vpop.permute.xlu1 %78 }
  0x87   :  { %v599_v17 = vpop.permute.xlu0 %74 }
  0x8a   :  { %v601_v18 = vpop.permute.xlu1 %80 }
  0x8b   :  { %v603_v19 = vpop.permute.xlu0 %76 }
  0x8e   :  { %v605_v20 = vpop.permute.xlu1 %84 }
  0x8f   :  { %v607_v21 = vpop.permute.xlu0 %82 }
  0x92   :  { %v609_v22 = vpop.permute.xlu1 %88 }
  0x93   :  { %v611_v23 = vpop.permute.xlu0 %86 }
  0x96   :  { %v613_v24 = vpop.permute.xlu1 %92 }
  0x97   :  { %v615_v25 = vpop.permute.xlu0 %90  ;;  %v108_v42 = vsel %vm106_vm0, %v603_v19, %v613_v24 }
  0x98   :  { %v107_v43 = vsel %vm106_vm0, %v599_v17, %v615_v25  ;;  %v178_v46 = vsel %vm645_vm1, -inf, %v108_v42 }
  0x99   :  { %v176_v47 = vsel %vm645_vm1, -inf, %v107_v43  ;;  %v214_v51 = vmax.f32 %v541_v3, %v178_v46 }
  0x9a   :  { %v617_v26 = vpop.permute.xlu1 %96  ;;  %v212_v54 = vmax.f32 %v535_v1, %v176_v47 }
  0x9b   :  { %v619_v27 = vpop.permute.xlu0 %94  ;;  %v110_v48 = vsel %vm106_vm0, %v601_v18, %v617_v26 }
  0x9c   :  { %v109_v49 = vsel %vm106_vm0, %v597_v16, %v619_v27  ;;  %v182_v55 = vsel %vm645_vm1, -inf, %v110_v48  ;;  %v117_v50 = vsel %vm106_vm0, %v619_v27, %v597_v16 }
  0x9d   :  { %v180_v58 = vsel %vm645_vm1, -inf, %v109_v49  ;;  %v218_v32 = vmax.f32 %v539_v2, %v182_v55 }
  0x9e   :  { %v621_v28 = vpop.permute.xlu1 %100  ;;  %v216_v43 = vmax.f32 %v533_v0, %v180_v58 }
  0x9f   :  { %v623_v29 = vpop.permute.xlu0 %98  ;;  %v112_v59 = vsel %vm106_vm0, %v605_v20, %v621_v28 }
  0xa0   :  { %v111_v63 = vsel %vm106_vm0, %v607_v21, %v623_v29  ;;  %v186_v46 = vsel %vm645_vm1, -inf, %v112_v59 }
  0xa1   :  { %v184_v2 = vsel %vm645_vm1, -inf, %v111_v63  ;;  %v222_v58 = vmax.f32 %v545_v4, %v186_v46 }
  0xa2   :  { %v625_v30 = vpop.permute.xlu1 %104 }
  0xa3   :  { %v627_v31 = vpop.permute.xlu0 %102  ;;  %v114_v0 = vsel %vm106_vm0, %v609_v22, %v625_v30 }
  0xa4   :  { %v113_v55 = vsel %vm106_vm0, %v611_v23, %v627_v31  ;;  %v190_v63 = vsel %vm645_vm1, -inf, %v114_v0  ;;  %v115_v0 = vsel %vm106_vm0, %v615_v25, %v599_v17 }
  0xa5   :  { %v188_v4 = vsel %vm645_vm1, -inf, %v113_v55 }
  0xa6   :  { %v629_v33 = vpop.permute.xlu1 %125 }
  0xa7   :  { %v631_v34 = vpop.permute.xlu0 %123 }
  0xaa   :  { %v635_v36 = vpop.permute.xlu1 %129 }
  0xab   :  { %v637_v37 = vpop.permute.xlu0 %127 }
  0xae   :  { %v641_v39 = vpop.permute.xlu1 %133 }
  0xaf   :  { %v643_v40 = vpop.permute.xlu0 %131 }
  0xb2   :  { %v657_v44 = vpop.permute.xlu1 %137 }
  0xb3   :  { %v659_v45 = vpop.permute.xlu0 %135 }
  0xb6   :  { %v142_v52 = vpop.permute.xlu1 %141 }
  0xb7   :  { %v140_v53 = vpop.permute.xlu0 %139  ;;  %v165_v56 = vsel %vm155_vm2, %v142_v52, %v629_v33 }
  0xb8   :  { %v164_v57 = vsel %vm155_vm2, %v140_v53, %v631_v34  ;;  %v198_v60 = vsel %vm674_vm3, -inf, %v165_v56 }
  0xb9   :  { %v196_v61 = vsel %vm674_vm3, -inf, %v164_v57  ;;  %v705_v1 = vmax.f32 %v214_v51, %v198_v60 }
  0xba   :  { %v707_v3 = vmax.f32 %v212_v54, %v196_v61  ;;  %v146_v38 = vpop.permute.xlu1 %145  ;;  %v37_v54 = vand.u32 15, %v699_v62  ;;  %v220_v61 = vmax.f32 %v547_v5, %v184_v2 }
  0xbb   :  { %v144_v42 = vpop.permute.xlu0 %143  ;;  %v167_v47 = vsel %vm155_vm2, %v146_v38, %v635_v36  ;;  %246 = vrot.lane.b32.xlu1 %v705_v1, %s506_s21 }
  0xbc   :  { %v166_v48 = vsel %vm155_vm2, %v144_v42, %v637_v37  ;;  %v202_v49 = vsel %vm674_vm3, -inf, %v167_v47  ;;  %244 = vrot.lane.b32.xlu0 %v707_v3, %s506_s21  ;;  %vm762_vm4 = vcmp.eq.s32.totalorder %v37_v54, 15  ;;  %vm779_vm5 = vcmp.eq.s32.totalorder %v37_v54, 0 }
  0xbd   :  { %v200_v51 = vsel %vm674_vm3, -inf, %v166_v48  ;;  %v738_v56 = vmax.f32 %v218_v32, %v202_v49  ;;  %v116_v48 = vsel %vm106_vm0, %v613_v24, %v603_v19  ;;  %v226_v49 = vmax.f32 %v551_v6, %v190_v63 }
  0xbe   :  { %v740_v57 = vmax.f32 %v216_v43, %v200_v51  ;;  %v150_v59 = vpop.permute.xlu1 %149  ;;  %v157_v19 = vsel %vm155_vm2, %v629_v33, %v142_v52  ;;  %v179_v17 = vsel %vm762_vm4, -inf, %v116_v48  ;;  %v177_v52 = vsel %vm762_vm4, -inf, %v115_v0 }
  0xbf   :  { %v148_v60 = vpop.permute.xlu0 %147  ;;  %v169_v47 = vsel %vm155_vm2, %v150_v59, %v641_v39  ;;  %250 = vrot.lane.b32.xlu1 %v738_v56, %s506_s21  ;;  %v118_v54 = vsel %vm106_vm0, %v617_v26, %v601_v18  ;;  %v159_v18 = vsel %vm155_vm2, %v635_v36, %v146_v38  ;;  %v213_v26 = vmax.f32 %v559_v9, %v177_v52 }
  0xc0   :  { %v168_v32 = vsel %vm155_vm2, %v148_v60, %v643_v40  ;;  %v206_v5 = vsel %vm674_vm3, -inf, %v169_v47  ;;  %248 = vrot.lane.b32.xlu0 %v740_v57, %s506_s21  ;;  %v183_v16 = vsel %vm762_vm4, -inf, %v118_v54  ;;  %v158_v27 = vsel %vm155_vm2, %v637_v37, %v144_v42 }
  0xc1   :  { %v204_v43 = vsel %vm674_vm3, -inf, %v168_v32  ;;  %v770_v41 = vmax.f32 %v222_v58, %v206_v5  ;;  %v224_v32 = vmax.f32 %v553_v7, %v188_v4  ;;  %v156_v7 = vsel %vm155_vm2, %v631_v34, %v140_v53 }
  0xc2   :  { %v772_v2 = vmax.f32 %v220_v61, %v204_v43  ;;  %v154_v55 = vpop.permute.xlu1 %153  ;;  %v199_v53 = vsel %vm779_vm5, -inf, %v157_v19  ;;  %v215_v61 = vmax.f32 %v557_v8, %v179_v17  ;;  %v197_v63 = vsel %vm779_vm5, -inf, %v156_v7 }
  0xc3   :  { %v152_v47 = vpop.permute.xlu0 %151  ;;  %v171_v24 = vsel %vm155_vm2, %v154_v55, %v657_v44  ;;  %254 = vrot.lane.b32.xlu1 %v770_v41, %s506_s21  ;;  %v181_v8 = vsel %vm762_vm4, -inf, %v117_v50  ;;  %v120_v36 = vsel %vm106_vm0, %v621_v28, %v605_v20  ;;  %v119_v9 = vsel %vm106_vm0, %v623_v29, %v607_v21 }
  0xc4   :  { %v170_v6 = vsel %vm155_vm2, %v152_v47, %v659_v45  ;;  %v210_v25 = vsel %vm674_vm3, -inf, %v171_v24  ;;  %252 = vrot.lane.b32.xlu0 %v772_v2, %s506_s21  ;;  %v844_v38 = vmax.f32 %v215_v61, %v199_v53  ;;  %v850_v4 = vmax.f32 %v213_v26, %v197_v63 }
  0xc5   :  { %v208_v33 = vsel %vm674_vm3, -inf, %v170_v6  ;;  %v812_v58 = vmax.f32 %v226_v49, %v210_v25  ;;  %v203_v37 = vsel %vm779_vm5, -inf, %v159_v18  ;;  %v219_v42 = vmax.f32 %v563_v10, %v183_v16 }
  0xc6   :  { %v814_v34 = vmax.f32 %v224_v32, %v208_v33  ;;  %v201_v5 = vsel %vm779_vm5, -inf, %v158_v27  ;;  %v161_v20 = vsel %vm155_vm2, %v641_v39, %v150_v59  ;;  %v217_v28 = vmax.f32 %v565_v11, %v181_v8 }
  0xc7   :  { %258 = vrot.lane.b32.xlu1 %v812_v58, %s506_s21  ;;  %v187_v21 = vsel %vm762_vm4, -inf, %v120_v36  ;;  %v160_v29 = vsel %vm155_vm2, %v643_v40, %v148_v60  ;;  %v185_v10 = vsel %vm762_vm4, -inf, %v119_v9  ;;  %v122_v39 = vsel %vm106_vm0, %v625_v30, %v609_v22 }
  0xc8   :  { %256 = vrot.lane.b32.xlu0 %v814_v34, %s506_s21  ;;  %v876_v59 = vmax.f32 %v219_v42, %v203_v37  ;;  %v121_v11 = vsel %vm106_vm0, %v627_v31, %v611_v23  ;;  %v882_v43 = vmax.f32 %v217_v28, %v201_v5  ;;  %v207_v40 = vsel %vm779_vm5, -inf, %v161_v20 }
  0xc9   :  { %v223_v60 = vmax.f32 %v569_v12, %v187_v21  ;;  %v205_v48 = vsel %vm779_vm5, -inf, %v160_v29  ;;  %v163_v22 = vsel %vm155_vm2, %v657_v44, %v154_v55  ;;  %v221_v30 = vmax.f32 %v571_v13, %v185_v10 }
  0xca   :  { %v191_v23 = vsel %vm762_vm4, -inf, %v122_v39  ;;  %v162_v31 = vsel %vm155_vm2, %v659_v45, %v152_v47  ;;  %v189_v12 = vsel %vm762_vm4, -inf, %v121_v11  ;;  %v211_v13 = vsel %vm779_vm5, -inf, %v163_v22 }
  0xcb   :  { %262 = vrot.lane.b32.xlu1 %v844_v38, %s506_s21  ;;  %v904_v0 = vmax.f32 %v223_v60, %v207_v40  ;;  %v906_v44 = vmax.f32 %v221_v30, %v205_v48  ;;  %v227_v49 = vmax.f32 %v575_v14, %v191_v23  ;;  %v209_v55 = vsel %vm779_vm5, -inf, %v162_v31 }
  0xcc   :  { %260 = vrot.lane.b32.xlu0 %v850_v4, %s506_s21  ;;  %v225_v45 = vmax.f32 %v577_v15, %v189_v12 }
  0xcd   :  { %v918_v46 = vmax.f32 %v227_v49, %v211_v13 }
  0xce   :  { %v920_v47 = vmax.f32 %v225_v45, %v209_v55 }
  0xcf   :  { %266 = vrot.lane.b32.xlu1 %v876_v59, %s506_s21 }
  0xd0   :  { %264 = vrot.lane.b32.xlu0 %v882_v43, %s506_s21 }
  0xd3   :  { %270 = vrot.lane.b32.xlu1 %v904_v0, %s506_s21 }
  0xd4   :  { %268 = vrot.lane.b32.xlu0 %v906_v44, %s506_s21 }
  0xd7   :  { %274 = vrot.lane.b32.xlu1 %v918_v46, %s506_s21 }
  0xd8   :  { %272 = vrot.lane.b32.xlu0 %v920_v47, %s506_s21 }
  0xdb   :  { %295 = vrot.lane.b32.xlu1 %v705_v1, %s503_s17 }
  0xdc   :  { %293 = vrot.lane.b32.xlu0 %v707_v3, %s503_s17 }
  0xdf   :  { %299 = vrot.lane.b32.xlu1 %v738_v56, %s503_s17 }
  0xe0   :  { %297 = vrot.lane.b32.xlu0 %v740_v57, %s503_s17 }
  0xe3   :  { %303 = vrot.lane.b32.xlu1 %v770_v41, %s503_s17 }
  0xe4   :  { %301 = vrot.lane.b32.xlu0 %v772_v2, %s503_s17 }
  0xe7   :  { %307 = vrot.lane.b32.xlu1 %v812_v58, %s503_s17 }
  0xe8   :  { %305 = vrot.lane.b32.xlu0 %v814_v34, %s503_s17 }
  0xeb   :  { %311 = vrot.lane.b32.xlu1 %v844_v38, %s503_s17 }
  0xec   :  { %309 = vrot.lane.b32.xlu0 %v850_v4, %s503_s17 }
  0xef   :  { %315 = vrot.lane.b32.xlu1 %v876_v59, %s503_s17 }
  0xf0   :  { %313 = vrot.lane.b32.xlu0 %v882_v43, %s503_s17 }
  0xf3   :  { %319 = vrot.lane.b32.xlu1 %v904_v0, %s503_s17 }
  0xf4   :  { %317 = vrot.lane.b32.xlu0 %v906_v44, %s503_s17 }
  0xf7   :  { %323 = vrot.lane.b32.xlu1 %v918_v46, %s503_s17 }
  0xf8   :  { %321 = vrot.lane.b32.xlu0 %v920_v47, %s503_s17 }
 0x12d   :  { %v247_v14 = vpop.permute.xlu1 %246 }
 0x12e   :  { %v245_v15 = vpop.permute.xlu0 %244 }
 0x131   :  { %v251_v51 = vpop.permute.xlu1 %250 }
 0x132   :  { %v249_v32 = vpop.permute.xlu0 %248 }
 0x135   :  { %v255_v19 = vpop.permute.xlu1 %254 }
 0x136   :  { %v253_v24 = vpop.permute.xlu0 %252 }
 0x139   :  { %v958_v6 = vpop.permute.xlu1 %258 }
 0x13a   :  { %v960_v17 = vpop.permute.xlu0 %256 }
 0x13d   :  { %v263_v7 = vpop.permute.xlu1 %262 }
 0x13e   :  { %v261_v25 = vpop.permute.xlu0 %260  ;;  %v286_v8 = vsel %vm276_vm6, %v263_v7, %v247_v14  ;;  %v278_v5 = vsel %vm276_vm6, %v247_v14, %v263_v7 }
 0x13f   :  { %v285_v36 = vsel %vm276_vm6, %v261_v25, %v245_v15  ;;  %v348_v20 = vsel %vm55_vm7, -inf, %v286_v8  ;;  %v277_v28 = vsel %vm276_vm6, %v245_v15, %v261_v25  ;;  %v383_v48 = vmax.f32 %v705_v1, %v278_v5 }
 0x140   :  { %v346_v21 = vsel %vm55_vm7, -inf, %v285_v36  ;;  %v384_v30 = vmax.f32 %v844_v38, %v348_v20  ;;  %v381_v23 = vmax.f32 %v707_v3, %v277_v28 }
 0x141   :  { %v267_v33 = vpop.permute.xlu1 %266  ;;  %v382_v31 = vmax.f32 %v850_v4, %v346_v21 }
 0x142   :  { %v265_v52 = vpop.permute.xlu0 %264  ;;  %v288_v37 = vsel %vm276_vm6, %v267_v33, %v251_v51  ;;  %v280_v29 = vsel %vm276_vm6, %v251_v51, %v267_v33 }
 0x143   :  { %v287_v42 = vsel %vm276_vm6, %v265_v52, %v249_v32  ;;  %v352_v39 = vsel %vm55_vm7, -inf, %v288_v37  ;;  %v279_v11 = vsel %vm276_vm6, %v249_v32, %v265_v52  ;;  %v387_v12 = vmax.f32 %v738_v56, %v280_v29 }
 0x144   :  { %v350_v40 = vsel %vm55_vm7, -inf, %v287_v42  ;;  %v388_v13 = vmax.f32 %v876_v59, %v352_v39  ;;  %v385_v49 = vmax.f32 %v740_v57, %v279_v11 }
 0x145   :  { %v271_v54 = vpop.permute.xlu1 %270  ;;  %v386_v55 = vmax.f32 %v882_v43, %v350_v40 }
 0x146   :  { %v269_v50 = vpop.permute.xlu0 %268  ;;  %v290_v22 = vsel %vm276_vm6, %v271_v54, %v255_v19  ;;  %v282_v1 = vsel %vm276_vm6, %v255_v19, %v271_v54 }
 0x147   :  { %v356_v14 = vsel %vm55_vm7, -inf, %v290_v22  ;;  %v289_v3 = vsel %vm276_vm6, %v269_v50, %v253_v24  ;;  %v391_v51 = vmax.f32 %v770_v41, %v282_v1  ;;  %v281_v33 = vsel %vm276_vm6, %v253_v24, %v269_v50 }
 0x148   :  { %v392_v25 = vmax.f32 %v904_v0, %v356_v14  ;;  %v354_v52 = vsel %vm55_vm7, -inf, %v289_v3  ;;  %v389_v5 = vmax.f32 %v772_v2, %v281_v33 }
 0x149   :  { %v962_v53 = vpop.permute.xlu1 %274 }
 0x14a   :  { %v964_v61 = vpop.permute.xlu0 %272  ;;  %v292_v41 = vsel %vm276_vm6, %v962_v53, %v958_v6  ;;  %v284_v29 = vsel %vm276_vm6, %v958_v6, %v962_v53 }
 0x14b   :  { %v360_v39 = vsel %vm55_vm7, -inf, %v292_v41  ;;  %v283_v2 = vsel %vm276_vm6, %v960_v17, %v964_v61 }
 0x14d   :  { %v296_v63 = vpop.permute.xlu1 %295 }
 0x14e   :  { %v294_v18 = vpop.permute.xlu0 %293 }
 0x151   :  { %v300_v26 = vpop.permute.xlu1 %299 }
 0x152   :  { %v298_v16 = vpop.permute.xlu0 %297 }
 0x155   :  { %v967_v27 = vpop.permute.xlu1 %303 }
 0x156   :  { %v974_v9 = vpop.permute.xlu0 %301 }
 0x159   :  { %v990_v10 = vpop.permute.xlu1 %307 }
 0x15a   :  { %v998_v60 = vpop.permute.xlu0 %305 }
 0x15d   :  { %v312_v45 = vpop.permute.xlu1 %311 }
 0x15e   :  { %v326_v38 = vsel %vm56_vm8, %v296_v63, %v312_v45  ;;  %v334_v56 = vsel %vm56_vm8, %v312_v45, %v296_v63  ;;  %v310_v4 = vpop.permute.xlu0 %309 }
 0x15f   :  { %v367_v57 = vsel %vm56_vm8, -inf, %v334_v56  ;;  %v400_v59 = vmax.f32 %v384_v30, %v326_v38  ;;  %v325_v43 = vsel %vm56_vm8, %v294_v18, %v310_v4  ;;  %v333_v15 = vsel %vm56_vm8, %v310_v4, %v294_v18 }
 0x160   :  { %v399_v32 = vmax.f32 %v383_v48, %v367_v57  ;;  %v365_v19 = vsel %vm56_vm8, -inf, %v333_v15  ;;  %v398_v7 = vmax.f32 %v382_v31, %v325_v43  ;;  %v291_v18 = vsel %vm276_vm6, %v964_v61, %v960_v17 }
 0x161   :  { %416 = vst [vmem:[#allocation5 + $0x18] sm:$0xff] %v400_v59  ;;  %v397_v54 = vmax.f32 %v381_v23, %v365_v19  ;;  %v316_v63 = vpop.permute.xlu1 %315  ;;  %v358_v40 = vsel %vm55_vm7, -inf, %v291_v18  ;;  %v396_v31 = vmax.f32 %v918_v46, %v360_v39 }
 0x162   :  { %415 = vst [vmem:[#allocation5 + $0x10] sm:$0xff] %v399_v32  ;;  %414 = vst [vmem:[#allocation5 + $0x8] sm:$0xff] %v398_v7  ;;  %v328_v0 = vsel %vm56_vm8, %v300_v26, %v316_v63  ;;  %v336_v24 = vsel %vm56_vm8, %v316_v63, %v300_v26  ;;  %v314_v50 = vpop.permute.xlu0 %313  ;;  %v390_v26 = vmax.f32 %v906_v44, %v354_v52 }
 0x163   :  { %413 = vst [vmem:[#allocation5] sm:$0xff] %v397_v54  ;;  %v371_v8 = vsel %vm56_vm8, -inf, %v336_v24  ;;  %v404_v36 = vmax.f32 %v388_v13, %v328_v0  ;;  %v327_v37 = vsel %vm56_vm8, %v298_v16, %v314_v50  ;;  %v335_v42 = vsel %vm56_vm8, %v314_v50, %v298_v16 }
 0x164   :  { %v403_v20 = vmax.f32 %v387_v12, %v371_v8  ;;  %v369_v28 = vsel %vm56_vm8, -inf, %v335_v42  ;;  %v402_v21 = vmax.f32 %v386_v55, %v327_v37  ;;  %v394_v55 = vmax.f32 %v920_v47, %v358_v40 }
 0x165   :  { %420 = vst [vmem:[#allocation5 + $0x38] sm:$0xff] %v404_v36  ;;  %v401_v11 = vmax.f32 %v385_v49, %v369_v28  ;;  %v320_v16 = vpop.permute.xlu1 %319  ;;  %v393_v49 = vmax.f32 %v814_v34, %v283_v2 }
 0x166   :  { %419 = vst [vmem:[#allocation5 + $0x30] sm:$0xff] %v403_v20  ;;  %418 = vst [vmem:[#allocation5 + $0x28] sm:$0xff] %v402_v21  ;;  %v330_v44 = vsel %vm56_vm8, %v967_v27, %v320_v16  ;;  %v338_v6 = vsel %vm56_vm8, %v320_v16, %v967_v27  ;;  %v318_v53 = vpop.permute.xlu0 %317  ;;  %v395_v27 = vmax.f32 %v812_v58, %v284_v29 }
 0x167   :  { %417 = vst [vmem:[#allocation5 + $0x20] sm:$0xff] %v401_v11  ;;  %v375_v48 = vsel %vm56_vm8, -inf, %v338_v6  ;;  %v408_v22 = vmax.f32 %v392_v25, %v330_v44  ;;  %v329_v62 = vsel %vm56_vm8, %v974_v9, %v318_v53  ;;  %v337_v17 = vsel %vm56_vm8, %v318_v53, %v974_v9 }
 0x168   :  { %v407_v61 = vmax.f32 %v391_v51, %v375_v48  ;;  %v373_v30 = vsel %vm56_vm8, -inf, %v337_v17  ;;  %v406_v23 = vmax.f32 %v390_v26, %v329_v62 }
 0x169   :  { %424 = vst [vmem:[#allocation5 + $0x58] sm:$0xff] %v408_v22  ;;  %v405_v12 = vmax.f32 %v389_v5, %v373_v30  ;;  %v324_v13 = vpop.permute.xlu1 %323 }
 0x16a   :  { %423 = vst [vmem:[#allocation5 + $0x50] sm:$0xff] %v407_v61  ;;  %422 = vst [vmem:[#allocation5 + $0x48] sm:$0xff] %v406_v23  ;;  %v332_v9 = vsel %vm56_vm8, %v990_v10, %v324_v13  ;;  %v340_v1 = vsel %vm56_vm8, %v324_v13, %v990_v10  ;;  %v322_v58 = vpop.permute.xlu0 %321 }
 0x16b   :  { %421 = vst [vmem:[#allocation5 + $0x40] sm:$0xff] %v405_v12  ;;  %v379_v46 = vsel %vm56_vm8, -inf, %v340_v1  ;;  %v412_v34 = vmax.f32 %v396_v31, %v332_v9  ;;  %v331_v47 = vsel %vm56_vm8, %v998_v60, %v322_v58  ;;  %v339_v45 = vsel %vm56_vm8, %v322_v58, %v998_v60 }
 0x16c   :  { %v411_v14 = vmax.f32 %v395_v27, %v379_v46  ;;  %v377_v10 = vsel %vm56_vm8, -inf, %v339_v45  ;;  %v410_v3 = vmax.f32 %v394_v55, %v331_v47 }
 0x16d   :  { %428 = vst [vmem:[#allocation5 + $0x78] sm:$0xff] %v412_v34  ;;  %v409_v38 = vmax.f32 %v393_v49, %v377_v10 }
 0x16e   :  { %427 = vst [vmem:[#allocation5 + $0x70] sm:$0xff] %v411_v14  ;;  %426 = vst [vmem:[#allocation5 + $0x68] sm:$0xff] %v410_v3 }
 0x16f   :  { %425 = vst [vmem:[#allocation5 + $0x60] sm:$0xff] %v409_v38 }
 0x170   :  { %486 = shalt.err (!%p483_p12)
}
 0x171   :  { %s487_s27 = scalar_lea.hbm %s1121_s1, 2048 }
 0x172   :  { %p488_p13 = scmp.ne.s32.totalorder %s1121_s1, %s487_s27  ;;  %p491_p0 = scmp.lt.u32.totalorder %s487_s27, %s1121_s1 }
 0x174   :  { %p493_p1 = pnand %p491_p0, %p488_p13 }
 0x176   :  { %496 = shalt.err (!%p493_p1)
}
 0x177   :  { %440 = dma.vmem_to_hbm [thread:$0]  %s435_s23, 2048, %s1121_s1, [#allocation4], %s502_s16, %s502_s16, %s503_s17  }
 0x178   :  { %499 = dma.done.wait [#allocation4], 2048  }
 0x179   :  { %500 = vsyncadd [#allocation4], 4294965248 }
 0x17a   :  { %444 = vsyncpa [#allocation3], 1 }
 0x17b   :  { %445 = vsyncpa [#allocation4], 1 }

</bundles_post_ra>
